<compile_context>
chip_gen: v6e
topology: v6e:2x2x1
jax: 0.10.0
libtpu: 0.0.40
codegen_flags: <defaults>
</compile_context>

<pallas_src>
import functools

import jax
import jax.numpy as jnp
import numpy as np
from jax.experimental import pallas as pl
from jax.experimental.pallas import tpu as pltpu

# Keep the pure-JAX reference at full f32 matmul precision on TPU.
jax.config.update("jax_default_matmul_precision", "highest")


def _mlp_kernel(params_ref, x_ref, y_ref, w_ref, logits_ref, loss_ref):
    x = x_ref[...]                              # [4, T]  (f32 or bf16)
    cdt = x.dtype                               # matmul-operand dtype

    # Static slices of the single packed parameter slab (f32 in VMEM).
    w1 = params_ref[0:10, 0:4].astype(cdt)      # [10, 4]
    w2 = params_ref[0:10, 4:14].astype(cdt)     # [10, 10]
    w3 = params_ref[0:3, 14:24].astype(cdt)     # [3, 10]
    b1 = params_ref[0:10, 24:25]                # [10, 1] f32
    b2 = params_ref[0:10, 25:26]                # [10, 1] f32
    b3 = params_ref[0:3, 26:27]                 # [3, 1]  f32

    # Linear(4,10)+ReLU, Linear(10,10)+ReLU, Linear(10,3); batch on lanes so
    # every activation vreg is fully lane-dense. Accumulation stays f32.
    h1 = jnp.maximum(jnp.dot(w1, x, preferred_element_type=jnp.float32) + b1, 0.0)
    h2 = jnp.maximum(
        jnp.dot(w2, h1.astype(cdt), preferred_element_type=jnp.float32) + b2, 0.0)
    logits = jnp.dot(w3, h2.astype(cdt), preferred_element_type=jnp.float32) + b3
    logits_ref[...] = logits                    # [3, T], lane-dense store

    # Softmax cross-entropy along the tiny class (sublane) axis.
    m = jnp.max(logits, axis=0, keepdims=True)                           # [1, T]
    lse = jnp.log(jnp.sum(jnp.exp(logits - m), axis=0, keepdims=True)) + m
    cls = jax.lax.broadcasted_iota(jnp.int32, logits.shape, 0)           # [3, T]
    onehot = (cls == y_ref[...]).astype(jnp.float32)                     # y: [1, T]
    picked = jnp.sum(logits * onehot, axis=0, keepdims=True)             # [1, T]
    # w_ref holds 1/N for real rows and 0 for padded rows -> summing all
    # partial rows outside the kernel yields the mean CE directly.
    loss_ref[...] = (lse - picked) * w_ref[...]                          # [1, T]


def _round_up(a, b):
    return (a + b - 1) // b * b


def _pack_params(params):
    """Pack all six weight/bias tensors into one lane-padded [16,128] f32 slab."""
    slab = jnp.zeros((16, 128), jnp.float32)
    slab = slab.at[0:10, 0:4].set(params["w1"])    # [10, 4]
    slab = slab.at[0:10, 4:14].set(params["w2"])   # [10, 10]
    slab = slab.at[0:3, 14:24].set(params["w3"])   # [3, 10]
    slab = slab.at[0:10, 24].set(params["b1"])     # [10]
    slab = slab.at[0:10, 25].set(params["b2"])     # [10]
    slab = slab.at[0:3, 26].set(params["b3"])      # [3]
    return slab


@functools.partial(jax.jit, static_argnames=("dtype",))
def mlp_forward_loss(x, y, params, dtype=jnp.float32):
    """x: [N,4] f32, y: [N] int, params: PyTorch-layout tensors
       (w1:[10,4], b1:[10], w2:[10,10], b2:[10], w3:[3,10], b3:[3]).

    Returns (logits [N,3] f32, loss [] f32) — matches _MLP.get_loss()."""
    n = x.shape[0]
    tile = 512 if n >= 512 else 128            # lane-dense batch tile
    n_pad = _round_up(n, tile)
    num_tiles = n_pad // tile

    # Batch on the lane axis; pad to a whole number of tiles.
    xt = jnp.zeros((4, n_pad), dtype).at[:, :n].set(x.T.astype(dtype))
    y2 = jnp.zeros((1, n_pad), jnp.int32).at[0, :n].set(y.astype(jnp.int32))
    wrow = jnp.zeros((1, n_pad), jnp.float32).at[0, :n].set(1.0 / n)
    slab = _pack_params(params)

    grid_spec = pltpu.PrefetchScalarGridSpec(
        num_scalar_prefetch=0,
        grid=(num_tiles,),
        in_specs=[
            pl.BlockSpec((16, 128), lambda i: (0, 0)),   # params: VMEM-resident
            pl.BlockSpec((4, tile), lambda i: (0, i)),   # x tile
            pl.BlockSpec((1, tile), lambda i: (0, i)),   # labels tile
            pl.BlockSpec((1, tile), lambda i: (0, i)),   # 1/N row-weights tile
        ],
        out_specs=(
            pl.BlockSpec((3, tile), lambda i: (0, i)),            # logits^T
            pl.BlockSpec((None, 1, tile), lambda i: (i, 0, 0)),   # loss partials
        ),
    )
    logits_t, loss_parts = pl.pallas_call(
        _mlp_kernel,
        out_shape=(
            jax.ShapeDtypeStruct((3, n_pad), jnp.float32),
            jax.ShapeDtypeStruct((num_tiles, 1, tile), jnp.float32),
        ),
        grid_spec=grid_spec,
        compiler_params=pltpu.CompilerParams(
            dimension_semantics=("parallel",)),
    )(slab, xt, y2, wrow)

    logits = logits_t[:, :n].T                 # [N, 3] (PyTorch orientation)
    loss = jnp.sum(loss_parts)                 # mean CE (1/N baked into wrow)
    return logits, loss


def _init_linear(key, fan_in, fan_out):
    """Mimics torch.nn.Linear.reset_parameters: U(-1/sqrt(fan_in), +)."""
    kw, kb = jax.random.split(key)
    bound = 1.0 / np.sqrt(float(fan_in))
    w = jax.random.uniform(kw, (fan_out, fan_in), jnp.float32, -bound, bound)
    b = jax.random.uniform(kb, (fan_out,), jnp.float32, -bound, bound)
    return w, b


def _ref_forward_loss(x, y, p):
    h1 = jnp.maximum(x @ p["w1"].T + p["b1"], 0.0)
    h2 = jnp.maximum(h1 @ p["w2"].T + p["b2"], 0.0)
    logits = h2 @ p["w3"].T + p["b3"]
    lse = jax.scipy.special.logsumexp(logits, axis=-1)
    picked = jnp.take_along_axis(logits, y[:, None].astype(jnp.int32), axis=-1)[:, 0]
    return logits, jnp.mean(lse - picked)


if __name__ == "__main__":
    key = jax.random.PRNGKey(0)
    kx, ky, k1, k2, k3 = jax.random.split(key, 5)

    # Iris-like problem: 150 samples, 4 features, 3 classes.
    N = 150
    x = jax.random.uniform(kx, (N, 4), jnp.float32, 0.0, 8.0)
    y = jax.random.randint(ky, (N,), 0, 3, jnp.int32)

    w1, b1 = _init_linear(k1, 4, 10)
    w2, b2 = _init_linear(k2, 10, 10)
    w3, b3 = _init_linear(k3, 10, 3)
    params = {"w1": w1, "b1": b1, "w2": w2, "b2": b2, "w3": w3, "b3": b3}

    ref_logits, ref_loss = _ref_forward_loss(x, y, params)

    # f32 path (v5e-friendly; exact-ish vs reference).
    logits, loss = mlp_forward_loss(x, y, params)
    logits, loss = jax.block_until_ready((logits, loss))
    assert logits.shape == (N, 3)
    assert jnp.allclose(logits, ref_logits, atol=2e-3, rtol=2e-3), "f32 logits mismatch"
    assert jnp.allclose(loss, ref_loss, atol=2e-3, rtol=2e-3), "f32 loss mismatch"

    # bf16 matmul-operand path (v6e/v7x-friendly); accum/softmax/CE stay f32.
    logits_bf, loss_bf = mlp_forward_loss(x, y, params, dtype=jnp.bfloat16)
    logits_bf, loss_bf = jax.block_until_ready((logits_bf, loss_bf))
    assert jnp.allclose(logits_bf, ref_logits, atol=0.5, rtol=0.1), "bf16 logits mismatch"
    assert jnp.allclose(loss_bf, ref_loss, atol=0.1, rtol=0.1), "bf16 loss mismatch"

    print("KERNEL_OK")
</pallas_src>

<mosaic_0001>
module attributes {stable_mosaic.version = 11 : i64} {
  func.func @_mlp_kernel(%arg0: i32, %arg1: memref<16x128xf32, #tpu.memory_space<vmem>>, %arg2: memref<4x128xf32, #tpu.memory_space<vmem>>, %arg3: memref<1x128xi32, #tpu.memory_space<vmem>>, %arg4: memref<1x128xf32, #tpu.memory_space<vmem>>, %arg5: memref<3x128xf32, #tpu.memory_space<vmem>>, %arg6: memref<1x1x128xf32, #tpu.memory_space<vmem>>) attributes {dimension_semantics = [#tpu.dimension_semantics<parallel>], iteration_bounds = array<i64: 2>, scalar_prefetch = 0 : i64, scratch_operands = 0 : i64, tpu.core_type = #tpu.core_type<tc>, window_params = [{pipeline_mode = #tpu.pipeline_mode<synchronous>, transform_indices = @transform_0, window_bounds = array<i64: 16, 128>}, {transform_indices = @transform_1, window_bounds = array<i64: 4, 128>}, {transform_indices = @transform_2, window_bounds = array<i64: 1, 128>}, {transform_indices = @transform_3, window_bounds = array<i64: 1, 128>}, {transform_indices = @transform_4, window_bounds = array<i64: 3, 128>}, {transform_indices = @transform_5, window_bounds = array<i64: 1, 1, 128>}]} {
    %c0 = arith.constant 0 : index
    %c0_0 = arith.constant 0 : index
    %0 = vector.load %arg2[%c0, %c0_0] : memref<4x128xf32, #tpu.memory_space<vmem>>, vector<4x128xf32>
    %c0_1 = arith.constant 0 : index
    %c0_2 = arith.constant 0 : index
    %1 = vector.load %arg1[%c0_1, %c0_2] : memref<16x128xf32, #tpu.memory_space<vmem>>, vector<10x4xf32>
    %c0_3 = arith.constant 0 : index
    %c4 = arith.constant 4 : index
    %2 = vector.load %arg1[%c0_3, %c4] : memref<16x128xf32, #tpu.memory_space<vmem>>, vector<10x10xf32>
    %c0_4 = arith.constant 0 : index
    %c14 = arith.constant 14 : index
    %3 = vector.load %arg1[%c0_4, %c14] : memref<16x128xf32, #tpu.memory_space<vmem>>, vector<3x10xf32>
    %c0_5 = arith.constant 0 : index
    %c24 = arith.constant 24 : index
    %4 = vector.load %arg1[%c0_5, %c24] : memref<16x128xf32, #tpu.memory_space<vmem>>, vector<10x1xf32>
    %c0_6 = arith.constant 0 : index
    %c25 = arith.constant 25 : index
    %5 = vector.load %arg1[%c0_6, %c25] : memref<16x128xf32, #tpu.memory_space<vmem>>, vector<10x1xf32>
    %c0_7 = arith.constant 0 : index
    %c26 = arith.constant 26 : index
    %6 = vector.load %arg1[%c0_7, %c26] : memref<16x128xf32, #tpu.memory_space<vmem>>, vector<3x1xf32>
    %cst = arith.constant dense<0.000000e+00> : vector<10x128xf32>
    %7 = tpu.matmul %1, %0, %cst {dimension_numbers = #tpu.dot_dimension_numbers<[1], [0], [0], [1], [0, 0, 1, 1], [], []>, precision = #tpu.contract_precision<fp32>} : vector<10x4xf32>, vector<4x128xf32>, vector<10x128xf32> -> vector<10x128xf32>
    %8 = vector.broadcast %4 : vector<10x1xf32> to vector<10x128xf32>
    %9 = arith.addf %7, %8 : vector<10x128xf32>
    %cst_8 = arith.constant 0.000000e+00 : f32
    %10 = vector.broadcast %cst_8 : f32 to vector<10x128xf32>
    %11 = arith.maximumf %9, %10 : vector<10x128xf32>
    %cst_9 = arith.constant dense<0.000000e+00> : vector<10x128xf32>
    %12 = tpu.matmul %2, %11, %cst_9 {dimension_numbers = #tpu.dot_dimension_numbers<[1], [0], [0], [1], [0, 0, 1, 1], [], []>, precision = #tpu.contract_precision<fp32>} : vector<10x10xf32>, vector<10x128xf32>, vector<10x128xf32> -> vector<10x128xf32>
    %13 = vector.broadcast %5 : vector<10x1xf32> to vector<10x128xf32>
    %14 = arith.addf %12, %13 : vector<10x128xf32>
    %cst_10 = arith.constant 0.000000e+00 : f32
    %15 = vector.broadcast %cst_10 : f32 to vector<10x128xf32>
    %16 = arith.maximumf %14, %15 : vector<10x128xf32>
    %cst_11 = arith.constant dense<0.000000e+00> : vector<3x128xf32>
    %17 = tpu.matmul %3, %16, %cst_11 {dimension_numbers = #tpu.dot_dimension_numbers<[1], [0], [0], [1], [0, 0, 1, 1], [], []>, precision = #tpu.contract_precision<fp32>} : vector<3x10xf32>, vector<10x128xf32>, vector<3x128xf32> -> vector<3x128xf32>
    %18 = vector.broadcast %6 : vector<3x1xf32> to vector<3x128xf32>
    %19 = arith.addf %17, %18 : vector<3x128xf32>
    %c0_12 = arith.constant 0 : index
    %c0_13 = arith.constant 0 : index
    %20 = vector.load %arg5[%c0_12, %c0_13] : memref<3x128xf32, #tpu.memory_space<vmem>>, vector<3x128xf32>
    tpu.vector_store %arg5[%c0_12, %c0_13], %19 {strides = array<i32>} : memref<3x128xf32, #tpu.memory_space<vmem>>, vector<3x128xf32>,
    %cst_14 = arith.constant dense<0xFF800000> : vector<128xf32>
    %21 = vector.multi_reduction <maximumf>, %19, %cst_14 [0] : vector<3x128xf32> to vector<128xf32>
    %22 = vector.shape_cast %21 : vector<128xf32> to vector<1x128xf32>
    %23 = vector.broadcast %22 : vector<1x128xf32> to vector<3x128xf32>
    %24 = arith.subf %19, %23 : vector<3x128xf32>
    %25 = math.exp %24 : vector<3x128xf32>
    %cst_15 = arith.constant dense<0.000000e+00> : vector<128xf32>
    %26 = vector.multi_reduction <add>, %25, %cst_15 [0] : vector<3x128xf32> to vector<128xf32>
    %27 = vector.shape_cast %26 : vector<128xf32> to vector<1x128xf32>
    %28 = math.log %27 : vector<1x128xf32>
    %29 = arith.addf %28, %22 : vector<1x128xf32>
    %30 = tpu.iota {dimensions = array<i32: 0>} : vector<3x128xi32>
    %c0_16 = arith.constant 0 : index
    %c0_17 = arith.constant 0 : index
    %31 = vector.load %arg3[%c0_16, %c0_17] : memref<1x128xi32, #tpu.memory_space<vmem>>, vector<1x128xi32>
    %32 = vector.broadcast %31 : vector<1x128xi32> to vector<3x128xi32>
    %33 = arith.cmpi eq, %30, %32 : vector<3x128xi32>
    %34 = arith.extui %33 : vector<3x128xi1> to vector<3x128xi32>
    %35 = arith.sitofp %34 : vector<3x128xi32> to vector<3x128xf32>
    %36 = arith.mulf %19, %35 : vector<3x128xf32>
    %cst_18 = arith.constant dense<0.000000e+00> : vector<128xf32>
    %37 = vector.multi_reduction <add>, %36, %cst_18 [0] : vector<3x128xf32> to vector<128xf32>
    %38 = vector.shape_cast %37 : vector<128xf32> to vector<1x128xf32>
    %39 = arith.subf %29, %38 : vector<1x128xf32>
    %c0_19 = arith.constant 0 : index
    %c0_20 = arith.constant 0 : index
    %40 = vector.load %arg4[%c0_19, %c0_20] : memref<1x128xf32, #tpu.memory_space<vmem>>, vector<1x128xf32>
    %41 = arith.mulf %39, %40 : vector<1x128xf32>
    %c0_21 = arith.constant 0 : index
    %c0_22 = arith.constant 0 : index
    %c0_23 = arith.constant 0 : index
    %42 = vector.load %arg6[%c0_21, %c0_22, %c0_23] : memref<1x1x128xf32, #tpu.memory_space<vmem>>, vector<1x1x128xf32>
    %43 = vector.shape_cast %42 : vector<1x1x128xf32> to vector<1x128xf32>
    %44 = vector.shape_cast %41 : vector<1x128xf32> to vector<1x1x128xf32>
    tpu.vector_store %arg6[%c0_21, %c0_22, %c0_23], %44 {strides = array<i32>} : memref<1x1x128xf32, #tpu.memory_space<vmem>>, vector<1x1x128xf32>,
    return
  }
  func.func @transform_0(%arg0: i32) -> (i32, i32) {
    %c0_i32 = arith.constant 0 : i32
    %c0_i32_0 = arith.constant 0 : i32
    %c0_i32_1 = arith.constant 0 : i32
    return %c0_i32, %c0_i32_0 : i32, i32
  }
  func.func @transform_1(%arg0: i32) -> (i32, i32) {
    %c0_i32 = arith.constant 0 : i32
    %c0_i32_0 = arith.constant 0 : i32
    return %c0_i32, %arg0 : i32, i32
  }
  func.func @transform_2(%arg0: i32) -> (i32, i32) {
    %c0_i32 = arith.constant 0 : i32
    %c0_i32_0 = arith.constant 0 : i32
    return %c0_i32, %arg0 : i32, i32
  }
  func.func @transform_3(%arg0: i32) -> (i32, i32) {
    %c0_i32 = arith.constant 0 : i32
    %c0_i32_0 = arith.constant 0 : i32
    return %c0_i32, %arg0 : i32, i32
  }
  func.func @transform_4(%arg0: i32) -> (i32, i32) {
    %c0_i32 = arith.constant 0 : i32
    %c0_i32_0 = arith.constant 0 : i32
    return %c0_i32, %arg0 : i32, i32
  }
  func.func @transform_5(%arg0: i32) -> (i32, i32, i32) {
    %c0_i32 = arith.constant 0 : i32
    %c0_i32_0 = arith.constant 0 : i32
    %c0_i32_1 = arith.constant 0 : i32
    return %arg0, %c0_i32, %c0_i32_0 : i32, i32, i32
  }
}

</mosaic_0001>

<bundles_post_ra>
// kernel: mlp_forward_loss.1
= control target key start
LH: loop header
LB: loop body
LE: loop exit
PB: predicated region body
PF: predicated region fallthrough
CT: control target
= control target key end

     0   :  { %s2160_s18 = smov 0   ;;  %s2281_s0 = inlined_call_operand.vmem [shape: f32[16,128], index: 0, kind: input, shape index: {}]   ;;  %s2282_s1 = inlined_call_operand.vmem [shape: f32[4,256], index: 1, kind: input, shape index: {}]   ;;  %s2283_s2 = inlined_call_operand.vmem [shape: s32[1,256], index: 2, kind: input, shape index: {}]   ;;  %s2284_s3 = inlined_call_operand.vmem [shape: f32[1,256], index: 3, kind: input, shape index: {}]   ;;  %s2285_s4 = inlined_call_operand.vmem [shape: f32[3,256], index: 4, kind: output, shape index: {0}]   ;;  %s2286_s5 = inlined_call_operand.vmem [shape: f32[2,1,128], index: 5, kind: output, shape index: {1}]  }
   0x1 LB: > { %s1907_s19 = sadd.s32 4294967295, %s2121_s18   ;;  %p1911_p0 = scmp.ge.s32.totalorder %s2121_s18, 1  ;;  %s2121_s18 = sphi %s2160_s18, %s16_s18  }
   0x2   : > { %p205_p1 = scmp.lt.s32.totalorder %s2121_s18, 3 }
   0x4   : > { %p206_p2 = pnand %p1911_p0, %p205_p1 }
   0x5   : > { %p240_p3 = scmp.lt.s32.totalorder (!%p206_p2), %s1907_s19, 1  ;;  %s2124_s24 = smov (!%p206_p2), 124  }
   0x6   : > { %209 = sbr.rel (%p206_p2) target bundleno = 740 (0x2e4), region = 36  ;;  %s2126_s6 = smov (!%p206_p2), 114  }
   0xb   : > { %v2171_v0 = vld [vmem:[%s2281_s0] sm:$0xff]  ;;  %v2176_v1 = vld [vmem:[%s2281_s0 + $0x8] sm:$0x3]  ;;  %vm271_vm0 = vcmask 31744   ;;  %s2288_s19 = smov (!%p240_p3, %s1907_s19), 1  ;;  %v2123_v6 = vmov 24  }
   0xc   : > { %v272_v2 = vsel %vm271_vm0, %v2171_v0, 0  ;;  %v274_v3 = vsel %vm271_vm0, %v2176_v1, 0  ;;  %2107 = vset.pattern.permute.xlu0 %v2123_v6  ;;  %779 = vrot.lane.b32.xlu1 %v2171_v0, %s2124_s24  ;;  %s1912_s25 = sshll.u32 %s2288_s19, 2  ;;  %vm276_vm1 = vcmask 1043456   ;;  %vm783_vm2 = vcmask 80896   ;;  %s246_s12 = scalar_lea.vmem %s2283_s2, %s2288_s19 }
   0xd   : > { %v346_v4 = vand.u32 4294901760, %v272_v2  ;;  %v356_v5 = vand.u32 4294901760, %v274_v3  ;;  %268 = vperm.xlu0 %2107, %v2176_v1   ;;  %s243_s28 = scalar_lea.vmem %s2282_s1, %s1912_s25  ;;  %v2125_v27 = vmov 25   ;;  %v2208_v29 = vld [vmem:[%s2281_s0] sm:$0x7]  ;;  %vm788_vm3 = vcmask 1041408   ;;  %s253_s9 = scalar_lea.vmem %s2285_s4, %s1912_s25 }
   0xe   : > { %v257_v9 = vld [vmem:[%s243_s28] sm:$0xf]  ;;  %2109 = vset.pattern.permute.xlu1 %v2125_v27  ;;  %vm2128_vm4 = vmmov 0   ;;  %vm1768_vm5 = vcmask 1042432   ;;  %s249_s15 = scalar_lea.vmem %s2284_s3, %s2288_s19  ;;  %s256_s20 = scalar_lea.vmem %s2286_s5, %s2288_s19 }
   0xf   : > { %v347_v7 = vsub.f32 %v272_v2, %v346_v4  ;;  %v357_v8 = vsub.f32 %v274_v3, %v356_v5  ;;  %1985 = vmatprep.mubr.f32.mxu1 %v346_v4  ;;  %v278_v12 = vsel %vm276_vm1, %v257_v9, 0 }
  0x10   : > { %781 = vrot.lane.b32.xlu1 %v2176_v1, %s2124_s24  ;;  %v311_v13 = vand.u32 4294901760, %v278_v12 }
  0x11   : > { %v348_v10 = vand.u32 4294901760, %v347_v7  ;;  %v358_v11 = vand.u32 4294901760, %v357_v8  ;;  %263 = vperm.xlu0 %2107, %v2171_v0  }
  0x12   : > { %1978 = vmatprep.subr.mxu0 %v311_v13  ;;  %v398_v18 = vsub.f32 %v278_v12, %v311_v13 }
  0x13   : > { %v349_v14 = vsub.f32 %v347_v7, %v348_v10  ;;  %v359_v15 = vsub.f32 %v357_v8, %v358_v11  ;;  %1979 = vmatpush3.msra.mxu0 %v311_v13 }
  0x14   : > { %v399_v19 = vand.u32 4294901760, %v398_v18  ;;  %1988 = vmatprep.subr.mxu0 %v398_v18  ;;  %772 = vperm.xlu1 %2109, %v2171_v0  }
  0x15   : > { %v350_v16 = vand.u32 4294901760, %v349_v14  ;;  %v360_v17 = vand.u32 4294901760, %v359_v15  ;;  %2108 = vset.pattern.permute.xlu0 %v2125_v27  ;;  %v2129_v14 = vmov 26  }
  0x16   : > { %v400_v20 = vsub.f32 %v398_v18, %v399_v19  ;;  %776 = vperm.xlu0 %2108, %v2176_v1  }
  0x17   : > { %1980 = vmatprep.mubr.f32.mxu0 %v350_v16 }
  0x18   : > { %1981 = vmatmul.mubr.f32.vlgmr.msra.gmra.mxu0 %v360_v17  ;;  %v401_v21 = vand.u32 4294901760, %v400_v20  ;;  %1301 = vrot.lane.b32.xlu1 %v2208_v29, %s2126_s6 }
  0x19   : > { %1989 = vmatpush3.msra.mxu0 %v398_v18  ;;  %1990 = vmatprep.mubr.f32.mxu0 %v347_v7 }
  0x1a   : > { %1998 = vmatprep.subr.mxu0 %v399_v19  ;;  %1983 = vmatprep.subr.mxu1 %v401_v21 }
  0x1b   : > { %1984 = vmatpush3.msra.mxu1 %v401_v21  ;;  %2110 = vset.pattern.permute.xlu0 %v2129_v14 }
  0x1c   : > { %1991 = vmatmul.mubr.f32.vlgmr.msra.gmra.mxu0 %v357_v8  ;;  %1986 = vmatmul.mubr.f32.vlgmr.msra.gmra.mxu1 %v356_v5 }
  0x1d   : > { %1999 = vmatpush3.msra.mxu0 %v399_v19  ;;  %2000 = vmatprep.mubr.f32.mxu0 %v346_v4 }
  0x1e   : > { %1993 = vmatprep.subr.mxu1 %v311_v13  ;;  %1995 = vmatprep.mubr.f32.mxu1 %v348_v10 }
  0x1f   : > { %1994 = vmatpush3.msra.mxu1 %v311_v13  ;;  %1298 = vperm.xlu0 %2110, %v2208_v29  }
  0x20   : > { %2001 = vmatmul.mubr.f32.vlgmr.msra.gmra.mxu0 %v356_v5  ;;  %2003 = vmatprep.subr.mxu1 %v311_v13 }
  0x21   : > { %1996 = vmatmul.mubr.f32.vlgmr.msra.gmra.mxu1 %v358_v11 }
  0x22   : > { %2004 = vmatpush3.msra.mxu1 %v311_v13  ;;  %2005 = vmatprep.mubr.f32.mxu1 %v346_v4  ;;  %v2127_v13 = vmov 0.0  }
  0x25   : > { %2006 = vmatmul.mubr.f32.vlgmr.msra.gmra.mxu1 %v356_v5 }
  0x7e   : > { %v780_v22 = vpop.permute.xlu1 %779 }
  0x7f   : > { %v784_v23 = vsel %vm783_vm2, %v780_v22, 0 }
  0x80   : > { %v2193_v24 = vand.u32 4294901760, %v784_v23 }
  0x82   : > { %v2196_v25 = vsub.f32 %v784_v23, %v2193_v24  ;;  %2019 = vmatprep.mubr.f32.mxu1 %v2193_v24  ;;  %v782_v33 = vpop.permute.xlu1 %781 }
  0x83   : > { %v786_v37 = vsel %vm783_vm2, %v782_v33, 0 }
  0x84   : > { %v861_v26 = vand.u32 4294901760, %v2196_v25  ;;  %v2212_v41 = vand.u32 4294901760, %v786_v37 }
  0x86   : > { %v862_v28 = vsub.f32 %v2196_v25, %v861_v26  ;;  %v870_v49 = vsub.f32 %v786_v37, %v2212_v41 }
  0x88   : > { %v863_v30 = vand.u32 4294901760, %v862_v28  ;;  %v269_v31 = vpop.permute.xlu0 %268  ;;  %v871_v56 = vand.u32 4294901760, %v870_v49 }
  0x8a   : > { %2012 = vmatprep.mubr.f32.mxu0 %v863_v30  ;;  %v872_v63 = vsub.f32 %v870_v49, %v871_v56 }
  0x8c   : > { %v264_v38 = vpop.permute.xlu0 %263  ;;  %v873_v4 = vand.u32 4294901760, %v872_v63 }
  0x8f   : > { %v773_v15 = vpop.permute.xlu1 %772 }
  0x91   : > { %v777_v19 = vpop.permute.xlu0 %776 }
  0x93   : > { %v1302_v18 = vpop.permute.xlu1 %1301 }
  0x94   : > { %v1303_v21 = vsel %vm783_vm2, %v1302_v18, 0 }
  0x95   : > { %v2232_v23 = vand.u32 4294901760, %v1303_v21 }
  0x97   : > { %v1376_v29 = vsub.f32 %v1303_v21, %v2232_v23 }
  0x9a   : > { %v1299_v63 = vpop.permute.xlu0 %1298 }
  0xd8   : > { %v1982_v32 = vpop.f32.mrf.mxu0 }
  0xd9   : > { %v363_v35 = vadd.f32 %v1982_v32, %v269_v31 }
  0xda   : > { %v352_v34 = vpop.f32.mrf.mxu0 }
  0xdb   : > { %v353_v42 = vadd.f32 %v352_v34, %v264_v38  ;;  %v1377_v38 = vand.u32 4294901760, %v1376_v29 }
  0xdc   : > { %v1992_v36 = vpop.f32.mrf.mxu0  ;;  %v1987_v39 = vpop.f32.mrf.mxu1 }
  0xdd   : > { %v445_v43 = vadd.f32 %v1987_v39, %v363_v35 }
  0xde   : > { %v518_v40 = vpop.f32.mrf.mxu0  ;;  %v438_v44 = vpop.f32.mrf.mxu1 }
  0xdf   : > { %v526_v45 = vadd.f32 %v1992_v36, %v445_v43  ;;  %v439_v46 = vadd.f32 %v438_v44, %v353_v42 }
  0xe0   : > { %v2002_v48 = vpop.f32.mrf.mxu0 }
  0xe1   : > { %v1997_v47 = vpop.f32.mrf.mxu1  ;;  %v519_v50 = vadd.f32 %v518_v40, %v439_v46 }
  0xe2   : > { %v608_v51 = vadd.f32 %v1997_v47, %v526_v45  ;;  %v681_v55 = vpop.f32.mrf.mxu0  ;;  %v1378_v45 = vsub.f32 %v1376_v29, %v1377_v38 }
  0xe3   : > { %v599_v52 = vpop.f32.mrf.mxu1 }
  0xe4   : > { %v688_v53 = vadd.f32 %v2002_v48, %v608_v51  ;;  %v600_v54 = vadd.f32 %v599_v52, %v519_v50  ;;  %v1379_v51 = vand.u32 4294901760, %v1378_v45 }
  0xe5   : > { %v2007_v57 = vpop.f32.mrf.mxu1 }
  0xe6   : > { %v682_v58 = vadd.f32 %v681_v55, %v600_v54  ;;  %v766_v59 = vadd.f32 %v2007_v57, %v688_v53 }
  0xe7   : > { %v759_v60 = vpop.f32.mrf.mxu1 }
  0xe8   : > { %v770_v61 = vmax.f32 %v766_v59, 0.0  ;;  %v760_v62 = vadd.f32 %v759_v60, %v682_v58 }
  0xea   : > { %v790_v0 = vsel %vm788_vm3, %v770_v61, 0  ;;  %v769_v1 = vmax.f32 %v760_v62, 0.0 }
  0xeb   : > { %v821_v2 = vand.u32 4294901760, %v790_v0 }
  0xec   : > { %v824_v3 = vand.u32 4294901760, %v769_v1 }
  0xed   : > { %v909_v5 = vsub.f32 %v790_v0, %v821_v2  ;;  %2008 = vmatprep.subr.mxu0 %v821_v2 }
  0xee   : > { %v916_v6 = vsub.f32 %v769_v1, %v824_v3  ;;  %2009 = vmatpush3.msra.mxu0 %v821_v2 }
  0xef   : > { %2010 = vmatprep.subr.mxu0 %v824_v3  ;;  %v910_v7 = vand.u32 4294901760, %v909_v5 }
  0xf0   : > { %2011 = vmatpush3.msra.mxu0 %v824_v3  ;;  %v917_v8 = vand.u32 4294901760, %v916_v6 }
  0xf1   : > { %2013 = vmatmul.mubr.f32.vlgmr.msra.gmra.mxu0 %v873_v4  ;;  %2022 = vmatprep.subr.mxu0 %v909_v5  ;;  %v911_v9 = vsub.f32 %v909_v5, %v910_v7 }
  0xf2   : > { %2023 = vmatpush3.msra.mxu0 %v909_v5  ;;  %2026 = vmatprep.mubr.f32.mxu0 %v2196_v25  ;;  %v918_v10 = vsub.f32 %v916_v6, %v917_v8 }
  0xf3   : > { %2024 = vmatprep.subr.mxu0 %v916_v6  ;;  %v912_v11 = vand.u32 4294901760, %v911_v9 }
  0xf4   : > { %2025 = vmatpush3.msra.mxu0 %v916_v6  ;;  %v919_v12 = vand.u32 4294901760, %v918_v10 }
  0xf5   : > { %2015 = vmatprep.subr.mxu1 %v912_v11  ;;  %2027 = vmatmul.mubr.f32.vlgmr.msra.gmra.mxu0 %v870_v49 }
  0xf6   : > { %2036 = vmatprep.subr.mxu0 %v910_v7  ;;  %2016 = vmatpush3.msra.mxu1 %v912_v11 }
  0xf7   : > { %2037 = vmatpush3.msra.mxu0 %v910_v7  ;;  %2040 = vmatprep.mubr.f32.mxu0 %v2193_v24 }
  0xf8   : > { %2017 = vmatprep.subr.mxu1 %v919_v12  ;;  %2038 = vmatprep.subr.mxu0 %v917_v8 }
  0xf9   : > { %2018 = vmatpush3.msra.mxu1 %v919_v12  ;;  %2039 = vmatpush3.msra.mxu0 %v917_v8 }
  0xfa   : > { %2020 = vmatmul.mubr.f32.vlgmr.msra.gmra.mxu1 %v2212_v41  ;;  %2029 = vmatprep.subr.mxu1 %v821_v2 }
  0xfb   : > { %2041 = vmatmul.mubr.f32.vlgmr.msra.gmra.mxu0 %v2212_v41  ;;  %2030 = vmatpush3.msra.mxu1 %v821_v2 }
  0xfc   : > { %2033 = vmatprep.mubr.f32.mxu1 %v861_v26  ;;  %2031 = vmatprep.subr.mxu1 %v824_v3 }
  0xfd   : > { %2032 = vmatpush3.msra.mxu1 %v824_v3  ;;  %2050 = vmatprep.subr.mxu0 %v2127_v13 }
  0xfe   : > { %2034 = vmatmul.mubr.f32.vlgmr.msra.gmra.mxu1 %v871_v56  ;;  %2043 = vmatprep.subr.mxu1 %v821_v2 }
  0xff   : > { %2044 = vmatpush3.msra.mxu1 %v821_v2  ;;  %2047 = vmatprep.mubr.f32.mxu1 %v2193_v24 }
 0x100   : > { %2045 = vmatprep.subr.mxu1 %v824_v3  ;;  %2054 = vmatprep.mubr.msk.f32.mxu0 %vm2128_vm4, %v2127_v13 }
 0x101   : > { %2046 = vmatpush3.msra.mxu1 %v824_v3 }
 0x102   : > { %2048 = vmatmul.mubr.f32.vlgmr.msra.gmra.mxu1 %v2212_v41  ;;  %2057 = vmatprep.subr.mxu1 %v2127_v13 }
 0x103   : > { %2061 = vmatprep.mubr.msk.f32.mxu1 %vm2128_vm4, %v2127_v13 }
 0x1b1   : > { %v2014_v16 = vpop.f32.mrf.mxu0 }
 0x1b2   : > { %v876_v22 = vadd.f32 %v2014_v16, %v777_v19 }
 0x1b3   : > { %v865_v17 = vpop.f32.mrf.mxu0 }
 0x1b4   : > { %v866_v26 = vadd.f32 %v865_v17, %v773_v15 }
 0x1b5   : > { %v2028_v20 = vpop.f32.mrf.mxu0 }
 0x1b7   : > { %v1038_v24 = vpop.f32.mrf.mxu0 }
 0x1ba   : > { %v2021_v25 = vpop.f32.mrf.mxu1 }
 0x1bb   : > { %v963_v27 = vadd.f32 %v2021_v25, %v876_v22  ;;  %v2042_v32 = vpop.f32.mrf.mxu0 }
 0x1bc   : > { %v956_v28 = vpop.f32.mrf.mxu1 }
 0x1bd   : > { %v957_v30 = vadd.f32 %v956_v28, %v866_v26  ;;  %v1046_v31 = vadd.f32 %v2028_v20, %v963_v27  ;;  %v1205_v40 = vpop.f32.mrf.mxu0  ;;  %v1789_v26 = vlaneseq  ;;  %v1914_v28 = vld [vmem:[%s246_s12] ss:$0 sm:$0xff] }
 0x1be   : > { %v2035_v33 = vpop.f32.mrf.mxu1 }
 0x1bf   : > { %v1129_v34 = vadd.f32 %v2035_v33, %v1046_v31  ;;  %v1039_v35 = vadd.f32 %v1038_v24, %v957_v30  ;;  %v1790_v27 = vshrl.u32 %v1789_v26, 7 }
 0x1c0   : > { %v1120_v36 = vpop.f32.mrf.mxu1 }
 0x1c1   : > { %v1121_v37 = vadd.f32 %v1120_v36, %v1039_v35  ;;  %v1212_v39 = vadd.f32 %v2042_v32, %v1129_v34  ;;  %vm1796_vm6 = vcmp.eq.s32.totalorder %v1790_v27, %v1914_v28 }
 0x1c2   : > { %v2049_v41 = vpop.f32.mrf.mxu1  ;;  %v1915_v31 = vsel %vm1796_vm6, 1.0, %v2127_v13 }
 0x1c3   : > { %v1291_v42 = vadd.f32 %v2049_v41, %v1212_v39  ;;  %v1206_v43 = vadd.f32 %v1205_v40, %v1121_v37 }
 0x1c4   : > { %v1284_v44 = vpop.f32.mrf.mxu1 }
 0x1c5   : > { %v1295_v46 = vmax.f32 %v1291_v42, 0.0  ;;  %v1285_v47 = vadd.f32 %v1284_v44, %v1206_v43 }
 0x1c7   : > { %v1306_v48 = vsel %vm788_vm3, %v1295_v46, 0  ;;  %v1294_v49 = vmax.f32 %v1285_v47, 0.0 }
 0x1c8   : > { %v1337_v50 = vand.u32 4294901760, %v1306_v48 }
 0x1c9   : > { %v1340_v52 = vand.u32 4294901760, %v1294_v49 }
 0x1ca   : > { %v1415_v53 = vsub.f32 %v1306_v48, %v1337_v50  ;;  %2051 = vmatpush3.msra.mxu0 %v1337_v50  ;;  %v1808_v48 = vld [vmem:[%s249_s15] sm:$0x1] }
 0x1cb   : > { %v1422_v54 = vsub.f32 %v1294_v49, %v1340_v52  ;;  %2052 = vmatprep.subr.mxu0 %v2127_v13 }
 0x1cc   : > { %v1416_v55 = vand.u32 4294901760, %v1415_v53  ;;  %2053 = vmatpush3.msra.mxu0 %v1340_v52 }
 0x1cd   : > { %v1423_v56 = vand.u32 4294901760, %v1422_v54  ;;  %2055 = vmatmul.mubr.f32.vlgmr.msra.gmra.mxu0 %v1379_v51  ;;  %2064 = vmatprep.subr.mxu0 %v2127_v13 }
 0x1ce   : > { %2065 = vmatpush3.msra.mxu0 %v1415_v53  ;;  %2068 = vmatprep.mubr.msk.f32.mxu0 %vm2128_vm4, %v2127_v13  ;;  %v1417_v57 = vsub.f32 %v1415_v53, %v1416_v55 }
 0x1cf   : > { %v1424_v58 = vsub.f32 %v1422_v54, %v1423_v56  ;;  %2066 = vmatprep.subr.mxu0 %v2127_v13 }
 0x1d0   : > { %2067 = vmatpush3.msra.mxu0 %v1422_v54  ;;  %v1418_v59 = vand.u32 4294901760, %v1417_v57 }
 0x1d1   : > { %2069 = vmatmul.mubr.f32.vlgmr.msra.gmra.mxu0 %v1376_v29  ;;  %2078 = vmatprep.subr.mxu0 %v2127_v13  ;;  %v1425_v60 = vand.u32 4294901760, %v1424_v58 }
 0x1d2   : > { %2058 = vmatpush3.msra.mxu1 %v1418_v59  ;;  %2079 = vmatpush3.msra.mxu0 %v1416_v55 }
 0x1d3   : > { %2059 = vmatprep.subr.mxu1 %v2127_v13  ;;  %2080 = vmatprep.subr.mxu0 %v2127_v13 }
 0x1d4   : > { %2060 = vmatpush3.msra.mxu1 %v1425_v60  ;;  %2081 = vmatpush3.msra.mxu0 %v1423_v56 }
 0x1d5   : > { %2082 = vmatprep.mubr.msk.f32.mxu0 %vm2128_vm4, %v2127_v13  ;;  %2062 = vmatmul.mubr.f32.vlgmr.msra.gmra.mxu1 %v2232_v23 }
 0x1d6   : > { %2071 = vmatprep.subr.mxu1 %v2127_v13  ;;  %2083 = vmatmul.mubr.f32.vlgmr.msra.gmra.mxu0 %v2232_v23 }
 0x1d7   : > { %2072 = vmatpush3.msra.mxu1 %v1337_v50  ;;  %2075 = vmatprep.mubr.msk.f32.mxu1 %vm2128_vm4, %v2127_v13 }
 0x1d8   : > { %2073 = vmatprep.subr.mxu1 %v2127_v13 }
 0x1d9   : > { %2074 = vmatpush3.msra.mxu1 %v1340_v52 }
 0x1da   : > { %2076 = vmatmul.mubr.f32.vlgmr.msra.gmra.mxu1 %v1377_v38  ;;  %2085 = vmatprep.subr.mxu1 %v2127_v13 }
 0x1db   : > { %2086 = vmatpush3.msra.mxu1 %v1337_v50  ;;  %2089 = vmatprep.mubr.msk.f32.mxu1 %vm2128_vm4, %v2127_v13 }
 0x1dc   : > { %2087 = vmatprep.subr.mxu1 %v2127_v13 }
 0x1dd   : > { %2088 = vmatpush3.msra.mxu1 %v1340_v52 }
 0x1de   : > { %2090 = vmatmul.mubr.f32.vlgmr.msra.gmra.mxu1 %v2232_v23 }
 0x28d   : > { %v1381_v61 = vpop.f32.mrf.mxu0 }
 0x28e   : > { %v1382_v2 = vadd.f32 %v1381_v61, %v1299_v63 }
 0x28f   : > { %v2056_v62 = vpop.f32.mrf.mxu0 }
 0x291   : > { %v1538_v0 = vpop.f32.mrf.mxu0 }
 0x293   : > { %v2070_v1 = vpop.f32.mrf.mxu0 }
 0x295   : > { %v1462_v3 = vpop.f32.mrf.mxu1 }
 0x296   : > { %v1463_v4 = vadd.f32 %v1462_v3, %v1382_v2  ;;  %v1690_v5 = vpop.f32.mrf.mxu0 }
 0x297   : > { %v2063_v6 = vpop.f32.mrf.mxu1 }
 0x298   : > { %v2084_v7 = vpop.f32.mrf.mxu0  ;;  %v1539_v8 = vadd.f32 %v1538_v0, %v1463_v4 }
 0x29a   : > { %v1613_v9 = vpop.f32.mrf.mxu1 }
 0x29b   : > { %v1614_v10 = vadd.f32 %v1613_v9, %v1539_v8 }
 0x29c   : > { %v2077_v11 = vpop.f32.mrf.mxu1 }
 0x29d   : > { %v1691_v12 = vadd.f32 %v1690_v5, %v1614_v10 }
 0x29e   : > { %v1763_v14 = vpop.f32.mrf.mxu1 }
 0x29f   : > { %v1764_v15 = vadd.f32 %v1763_v14, %v1691_v12 }
 0x2a0   : > { %v2091_v16 = vpop.f32.mrf.mxu1 }
 0x2a1   : > { %1767 = vst [vmem:[%s253_s9] sm:$0x7] %v1764_v15  ;;  %v1769_v17 = vsel %vm1768_vm5, %v1764_v15, -inf  ;;  %v1799_v33 = vmul.f32 %v1915_v31, %v1764_v15 }
 0x2a2   : > { %v1770_v18 = vrot.slane %v1769_v17, 4 }
 0x2a3   : > { %v1800_v36 = vsel %vm1768_vm5, %v1799_v33, 0.0 }
 0x2a4   : > { %v1771_v19 = vmax.f32 %v1769_v17, %v1770_v18  ;;  %v1801_v39 = vrot.slane %v1800_v36, 4 }
 0x2a6   : > { %v1772_v20 = vrot.slane %v1771_v19, 2  ;;  %v1802_v41 = vadd.f32 %v1801_v39, %v1800_v36 }
 0x2a8   : > { %v1773_v21 = vmax.f32 %v1771_v19, %v1772_v20  ;;  %v1803_v42 = vrot.slane %v1802_v41, 2 }
 0x2aa   : > { %v1774_v22 = vrot.slane %v1773_v21, 1  ;;  %v1804_v43 = vadd.f32 %v1803_v42, %v1802_v41 }
 0x2ac   : > { %v1775_v23 = vmax.f32 %v1773_v21, %v1774_v22  ;;  %v1805_v44 = vrot.slane %v1804_v43, 1 }
 0x2ae   : > { %v1776_v24 = vsub.f32 %v1764_v15, %v1775_v23  ;;  %v1806_v47 = vadd.f32 %v1805_v44, %v1804_v43 }
 0x2b0   : > { %v1777_v25 = vmul.f32 1.442695, %v1776_v24 }
 0x2b2   : > { %2111 = vpow2.f32 %v1777_v25 }
 0x2bf   : > { %v2112_v30 = vpop.eup %2111 }
 0x2c0   : > { %v1779_v29 = vsel %vm1768_vm5, %v2112_v30, 0.0 }
 0x2c1   : > { %v1780_v32 = vrot.slane %v1779_v29, 4 }
 0x2c3   : > { %v1781_v34 = vadd.f32 %v1780_v32, %v1779_v29 }
 0x2c5   : > { %v1782_v35 = vrot.slane %v1781_v34, 2 }
 0x2c7   : > { %v1783_v37 = vadd.f32 %v1782_v35, %v1781_v34 }
 0x2c9   : > { %v1784_v38 = vrot.slane %v1783_v37, 1 }
 0x2cb   : > { %v1785_v40 = vadd.f32 %v1784_v38, %v1783_v37 }
 0x2cd   : > { %2113 = vlog2.f32 %v1785_v40 }
 0x2da   : > { %v2114_v13 = vpop.eup %2113 }
 0x2db   : > { %v1787_v45 = vmul.f32 0.6931472, %v2114_v13 }
 0x2dd   : > { %v1788_v46 = vadd.f32 %v1787_v45, %v1775_v23 }
 0x2df   : > { %v1807_v49 = vsub.f32 %v1788_v46, %v1806_v47 }
 0x2e1   : > { %v1809_v50 = vmul.f32 %v1808_v48, %v1807_v49 }
 0x2e3   : > { %1810 = vst [vmem:[%s256_s20] sm:$0x1] %v1809_v50 }
 0x2e4 PF: > { %s16_s18 = sadd.s32 1, %s2121_s18  }
 0x2e5   : > { %p13_p4 = scmp.ge.s32.totalorder %s16_s18, 4  }
 0x2e7   :  { %15 = sbr.rel (!%p13_p4) target bundleno = 1 (0x1), region = 84 }

</bundles_post_ra>
